<compile_context>
chip_gen: v7x
topology: tpu7x:2x2x1
jax: 0.10.0
libtpu: 0.0.40
codegen_flags: <defaults>
</compile_context>

<pallas_src>
import functools

import jax
import jax.numpy as jnp
from jax.experimental import pallas as pl
from jax.experimental.pallas import tpu as pltpu


def _mlp_kernel(x_ref, w1_ref, b1_ref, w2_ref, b2_ref, o_ref):
    # fc1: (TB,128)f32 @ (128,32)f32 -> f32 acc, +bias, ReLU
    h = jnp.dot(x_ref[...], w1_ref[...], preferred_element_type=jnp.float32)
    h = jnp.maximum(h + b1_ref[...], 0.0)
    # fc2: (TB,32)f32 @ (32,6)f32 -> f32 acc, +bias  (MXU has huge slack)
    out = jnp.dot(h, w2_ref[...], preferred_element_type=jnp.float32)
    o_ref[...] = (out + b2_ref[...]).astype(o_ref.dtype)


def _round_up(n, m):
    return ((n + m - 1) // m) * m


def _pick_tile(batch, block_b, min_steps=8):
    """Largest tile <= block_b that still yields >= min_steps grid steps
    (when the batch is big enough), rounded to the 8-row sublane tile."""
    per_step = _round_up(pl.cdiv(batch, min_steps), 8)
    return max(8, min(block_b, per_step))


@functools.partial(jax.jit, static_argnames=("block_b",))
def classification_model_forward(x, w1_t, b1, w2_t, b2, *, block_b=8192):
    """x: (B,128) f32; w1_t: (128,32); b1: (1,32); w2_t: (32,6); b2: (1,6)."""
    B, K = x.shape
    assert K == 128 and w1_t.shape == (128, 32) and w2_t.shape == (32, 6)

    tb = _pick_tile(B, block_b)
    grid = (pl.cdiv(B, tb),)

    return pl.pallas_call(
        _mlp_kernel,
        out_shape=jax.ShapeDtypeStruct((B, 6), x.dtype),
        grid=grid,
        in_specs=[
            pl.BlockSpec((tb, 128), lambda i: (i, 0)),   # x  (tiled over batch)
            pl.BlockSpec((128, 32), lambda i: (0, 0)),   # w1_t (resident)
            pl.BlockSpec((1, 32), lambda i: (0, 0)),     # b1   (resident)
            pl.BlockSpec((32, 6), lambda i: (0, 0)),     # w2_t (resident)
            pl.BlockSpec((1, 6), lambda i: (0, 0)),      # b2   (resident)
        ],
        out_specs=pl.BlockSpec((tb, 6), lambda i: (i, 0)),
        compiler_params=pltpu.CompilerParams(
            dimension_semantics=("parallel",),
            # 2x (tb,128) f32 input buffers + 2x (tb,6) output + weights + h:
            # ~9 MiB at tb=8192; leave generous headroom within every gen's
            # scoped VMEM (32 MiB v6e/v7x default).
            vmem_limit_bytes=32 * 1024 * 1024,
        ),
    )(x, w1_t, b1, w2_t, b2)


def init_params(key):
    """nn.Linear-shaped params: fc1.weight (32,128), fc1.bias (32,),
    fc2.weight (6,32), fc2.bias (6,)."""
    k1, k2, k3, k4 = jax.random.split(key, 4)
    bound1 = 1.0 / jnp.sqrt(128.0)
    bound2 = 1.0 / jnp.sqrt(32.0)
    w1 = jax.random.uniform(k1, (32, 128), jnp.float32, -bound1, bound1)
    b1 = jax.random.uniform(k2, (32,), jnp.float32, -bound1, bound1)
    w2 = jax.random.uniform(k3, (6, 32), jnp.float32, -bound2, bound2)
    b2 = jax.random.uniform(k4, (6,), jnp.float32, -bound2, bound2)
    return w1, b1, w2, b2


def prepare_kernel_params(w1, b1, w2, b2):
    """One-time (outside the jitted call path) reshape/transpose of the
    PyTorch-layout params into the kernel's layout."""
    return w1.T, b1.reshape(1, 32), w2.T, b2.reshape(1, 6)


def _reference_f32(x, w1, b1, w2, b2):
    """Full-f32 PyTorch-equivalent forward."""
    h = jnp.maximum(x @ w1.T + b1, 0.0)
    return h @ w2.T + b2


if __name__ == "__main__":
    key = jax.random.PRNGKey(0)
    kx, kp, kx2 = jax.random.split(key, 3)

    w1, b1, w2, b2 = init_params(kp)
    w1_t, b1_r, w2_t, b2_r = prepare_kernel_params(w1, b1, w2, b2)

    # --- tiny batch (module spec demo) ---
    B = 2
    x = jax.random.normal(kx, (B, 128), jnp.float32)
    out = classification_model_forward(x, w1_t, b1_r, w2_t, b2_r)
    out = jax.block_until_ready(out)
    assert out.shape == (B, 6)

    ref = _reference_f32(x, w1, b1, w2, b2)
    assert jnp.allclose(out, ref, atol=1e-4, rtol=1e-4)

    # --- larger batch: exercises the batch grid / pipelining path ---
    B2 = 2048
    x2 = jax.random.normal(kx2, (B2, 128), jnp.float32)
    out2 = jax.block_until_ready(
        classification_model_forward(x2, w1_t, b1_r, w2_t, b2_r)
    )
    ref2 = _reference_f32(x2, w1, b1, w2, b2)
    assert out2.shape == (B2, 6)
    assert jnp.allclose(out2, ref2, atol=1e-4, rtol=1e-4)

    print("KERNEL_OK")
</pallas_src>

<mosaic_0001>
module attributes {stable_mosaic.version = 11 : i64} {
  func.func @_mlp_kernel(%arg0: i32, %arg1: memref<8x128xf32, #tpu.memory_space<vmem>>, %arg2: memref<128x32xf32, #tpu.memory_space<vmem>>, %arg3: memref<1x32xf32, #tpu.memory_space<vmem>>, %arg4: memref<32x6xf32, #tpu.memory_space<vmem>>, %arg5: memref<1x6xf32, #tpu.memory_space<vmem>>, %arg6: memref<8x6xf32, #tpu.memory_space<vmem>>) attributes {dimension_semantics = [#tpu.dimension_semantics<parallel>], iteration_bounds = array<i64: 1>, scalar_prefetch = 0 : i64, scratch_operands = 0 : i64, tpu.core_type = #tpu.core_type<tc>, window_params = [{transform_indices = @transform_0, window_bounds = array<i64: 8, 128>}, {pipeline_mode = #tpu.pipeline_mode<synchronous>, transform_indices = @transform_1, window_bounds = array<i64: 128, 32>}, {pipeline_mode = #tpu.pipeline_mode<synchronous>, transform_indices = @transform_2, window_bounds = array<i64: 1, 32>}, {pipeline_mode = #tpu.pipeline_mode<synchronous>, transform_indices = @transform_3, window_bounds = array<i64: 32, 6>}, {pipeline_mode = #tpu.pipeline_mode<synchronous>, transform_indices = @transform_4, window_bounds = array<i64: 1, 6>}, {transform_indices = @transform_5, window_bounds = array<i64: 8, 6>}]} {
    %c0 = arith.constant 0 : index
    %c0_0 = arith.constant 0 : index
    %0 = vector.load %arg1[%c0, %c0_0] : memref<8x128xf32, #tpu.memory_space<vmem>>, vector<8x128xf32>
    %c0_1 = arith.constant 0 : index
    %c0_2 = arith.constant 0 : index
    %1 = vector.load %arg2[%c0_1, %c0_2] : memref<128x32xf32, #tpu.memory_space<vmem>>, vector<128x32xf32>
    %cst = arith.constant dense<0.000000e+00> : vector<8x32xf32>
    %2 = tpu.matmul %0, %1, %cst {dimension_numbers = #tpu.dot_dimension_numbers<[1], [0], [0], [1], [0, 0, 1, 1], [], []>} : vector<8x128xf32>, vector<128x32xf32>, vector<8x32xf32> -> vector<8x32xf32>
    %c0_3 = arith.constant 0 : index
    %c0_4 = arith.constant 0 : index
    %3 = vector.load %arg3[%c0_3, %c0_4] : memref<1x32xf32, #tpu.memory_space<vmem>>, vector<1x32xf32>
    %4 = vector.broadcast %3 : vector<1x32xf32> to vector<8x32xf32>
    %5 = arith.addf %2, %4 : vector<8x32xf32>
    %cst_5 = arith.constant 0.000000e+00 : f32
    %6 = vector.broadcast %cst_5 : f32 to vector<8x32xf32>
    %7 = arith.maximumf %5, %6 : vector<8x32xf32>
    %c0_6 = arith.constant 0 : index
    %c0_7 = arith.constant 0 : index
    %8 = vector.load %arg4[%c0_6, %c0_7] : memref<32x6xf32, #tpu.memory_space<vmem>>, vector<32x6xf32>
    %cst_8 = arith.constant dense<0.000000e+00> : vector<8x6xf32>
    %9 = tpu.matmul %7, %8, %cst_8 {dimension_numbers = #tpu.dot_dimension_numbers<[1], [0], [0], [1], [0, 0, 1, 1], [], []>} : vector<8x32xf32>, vector<32x6xf32>, vector<8x6xf32> -> vector<8x6xf32>
    %c0_9 = arith.constant 0 : index
    %c0_10 = arith.constant 0 : index
    %10 = vector.load %arg5[%c0_9, %c0_10] : memref<1x6xf32, #tpu.memory_space<vmem>>, vector<1x6xf32>
    %11 = vector.broadcast %10 : vector<1x6xf32> to vector<8x6xf32>
    %12 = arith.addf %9, %11 : vector<8x6xf32>
    %c0_11 = arith.constant 0 : index
    %c0_12 = arith.constant 0 : index
    %13 = vector.load %arg6[%c0_11, %c0_12] : memref<8x6xf32, #tpu.memory_space<vmem>>, vector<8x6xf32>
    tpu.vector_store %arg6[%c0_11, %c0_12], %12 {strides = array<i32>} : memref<8x6xf32, #tpu.memory_space<vmem>>, vector<8x6xf32>,
    return
  }
  func.func @transform_0(%arg0: i32) -> (i32, i32) {
    %c0_i32 = arith.constant 0 : i32
    %c0_i32_0 = arith.constant 0 : i32
    return %arg0, %c0_i32 : i32, i32
  }
  func.func @transform_1(%arg0: i32) -> (i32, i32) {
    %c0_i32 = arith.constant 0 : i32
    %c0_i32_0 = arith.constant 0 : i32
    %c0_i32_1 = arith.constant 0 : i32
    return %c0_i32, %c0_i32_0 : i32, i32
  }
  func.func @transform_2(%arg0: i32) -> (i32, i32) {
    %c0_i32 = arith.constant 0 : i32
    %c0_i32_0 = arith.constant 0 : i32
    %c0_i32_1 = arith.constant 0 : i32
    return %c0_i32, %c0_i32_0 : i32, i32
  }
  func.func @transform_3(%arg0: i32) -> (i32, i32) {
    %c0_i32 = arith.constant 0 : i32
    %c0_i32_0 = arith.constant 0 : i32
    %c0_i32_1 = arith.constant 0 : i32
    return %c0_i32, %c0_i32_0 : i32, i32
  }
  func.func @transform_4(%arg0: i32) -> (i32, i32) {
    %c0_i32 = arith.constant 0 : i32
    %c0_i32_0 = arith.constant 0 : i32
    %c0_i32_1 = arith.constant 0 : i32
    return %c0_i32, %c0_i32_0 : i32, i32
  }
  func.func @transform_5(%arg0: i32) -> (i32, i32) {
    %c0_i32 = arith.constant 0 : i32
    %c0_i32_0 = arith.constant 0 : i32
    return %arg0, %c0_i32 : i32, i32
  }
}

</mosaic_0001>

<bundles_post_ra>
// kernel: classification_model_forward.1
= control target key start
LH: loop header
LB: loop body
LE: loop exit
PB: predicated region body
PF: predicated region fallthrough
CT: control target
= control target key end

     0   :  { %10 = vsyncpa [#allocation3], 0  ;;  %v350_v2 = vmov 0.0|0.0   ;;  %vm351_vm0 = vmmov 0   ;;  %v352_v6 = vmov 0.0   ;;  %vm127_vm1 = vcmask 261120   ;;  %s467_s0 = inlined_call_operand.vmem [shape: f32[2,128], index: 0, kind: input, shape index: {}]   ;;  %s468_s1 = inlined_call_operand.vmem [shape: f32[128,32], index: 1, kind: input, shape index: {}]   ;;  %s469_s2 = inlined_call_operand.vmem [shape: f32[1,32], index: 2, kind: input, shape index: {}]   ;;  %s470_s3 = inlined_call_operand.vmem [shape: f32[32,6], index: 3, kind: input, shape index: {}]   ;;  %s471_s4 = inlined_call_operand.vmem [shape: f32[1,6], index: 4, kind: input, shape index: {}]   ;;  %s472_s5 = inlined_call_operand.hbm [shape: f32[2,6], index: 5, kind: output, shape index: {}]  }
   0x1   :  { %v22_v0 = vld [vmem:[%s468_s1] sm:$0xff]  ;;  %v23_v1 = vld [vmem:[%s468_s1 + $0x8] sm:$0xff]  ;;  %290 = vmatprep.subr.bf16.mxu0 %v350_v2  ;;  %v24_v4 = vld [vmem:[%s468_s1 + $0x10] sm:$0xff]  ;;  %314 = vmatprep.subr.bf16.mxu1 %v350_v2  ;;  %vm201_vm2 = vcmask 48128  }
   0x2   :  { %v291_v3 = vpack.c.bf16 %v23_v1, %v22_v0  ;;  %v25_v5 = vld [vmem:[%s468_s1 + $0x18] sm:$0xff]  ;;  %276 = vmatprep.mubr.msk.f32.mxu0 %vm351_vm0, %v352_v6  ;;  %287 = vmatprep.mubr.msk.f32.mxu1 %vm351_vm0, %v352_v6  ;;  %v26_v8 = vld [vmem:[%s468_s1 + $0x20] sm:$0xff]  ;;  %v27_v9 = vld [vmem:[%s468_s1 + $0x28] sm:$0xff] }
   0x3   :  { %v294_v7 = vpack.c.bf16 %v25_v5, %v24_v4  ;;  %v116_v10 = vld [vmem:[%s470_s3] sm:$0xff]  ;;  %v117_v11 = vld [vmem:[%s470_s3 + $0x8] sm:$0xff]  ;;  %v297_v12 = vpack.c.bf16 %v27_v9, %v26_v8  ;;  %v28_v14 = vld [vmem:[%s468_s1 + $0x30] sm:$0xff] }
   0x4   :  { %292 = vmatpush3.bf16.msra.mxu0 %v291_v3  ;;  %v315_v13 = vpack.c.bf16 %v117_v11, %v116_v10  ;;  %v29_v15 = vld [vmem:[%s468_s1 + $0x38] sm:$0xff]  ;;  %v30_v17 = vld [vmem:[%s468_s1 + $0x40] sm:$0xff]  ;;  %v31_v18 = vld [vmem:[%s468_s1 + $0x48] sm:$0xff] }
   0x5   :  { %293 = vmatprep.subr.bf16.mxu0 %v350_v2  ;;  %v300_v16 = vpack.c.bf16 %v29_v15, %v28_v14  ;;  %v303_v19 = vpack.c.bf16 %v31_v18, %v30_v17  ;;  %v32_v20 = vld [vmem:[%s468_s1 + $0x50] sm:$0xff]  ;;  %v33_v21 = vld [vmem:[%s468_s1 + $0x58] sm:$0xff]  ;;  %v34_v23 = vld [vmem:[%s468_s1 + $0x60] sm:$0xff] }
   0x6   :  { %316 = vmatpush3.bf16.msra.mxu1 %v315_v13  ;;  %v306_v22 = vpack.c.bf16 %v33_v21, %v32_v20  ;;  %v35_v24 = vld [vmem:[%s468_s1 + $0x68] sm:$0xff]  ;;  %v36_v26 = vld [vmem:[%s468_s1 + $0x70] sm:$0xff]  ;;  %v37_v27 = vld [vmem:[%s468_s1 + $0x78] sm:$0xff] }
   0x7   :  { %317 = vmatprep.subr.bf16.mxu1 %v350_v2  ;;  %v309_v25 = vpack.c.bf16 %v35_v24, %v34_v23  ;;  %v312_v28 = vpack.c.bf16 %v37_v27, %v36_v26  ;;  %v21_v29 = vld [vmem:[%s467_s0] sm:$0xff]  ;;  %v118_v30 = vld [vmem:[%s470_s3 + $0x10] sm:$0xff]  ;;  %v119_v31 = vld [vmem:[%s470_s3 + $0x18] sm:$0xff] }
   0x8   :  { %295 = vmatpush3.bf16.msra.mxu0 %v294_v7  ;;  %v318_v32 = vpack.c.bf16 %v119_v31, %v118_v30  ;;  %v219_v33 = vld [vmem:[%s469_s2] ss:$0 sm:$0xff] }
   0x9   :  { %296 = vmatprep.subr.bf16.mxu0 %v350_v2  ;;  %v220_v38 = vld [vmem:[%s471_s4] ss:$0 sm:$0xff] }
   0xa   :  { %319 = vmatpush3.bf16.msra.mxu1 %v318_v32 }
   0xc   :  { %298 = vmatpush3.bf16.msra.mxu0 %v297_v12 }
   0xd   :  { %299 = vmatprep.subr.bf16.mxu0 %v350_v2 }
  0x10   :  { %301 = vmatpush3.bf16.msra.mxu0 %v300_v16 }
  0x11   :  { %302 = vmatprep.subr.bf16.mxu0 %v350_v2 }
  0x14   :  { %304 = vmatpush3.bf16.msra.mxu0 %v303_v19 }
  0x15   :  { %305 = vmatprep.subr.bf16.mxu0 %v350_v2 }
  0x18   :  { %307 = vmatpush3.bf16.msra.mxu0 %v306_v22 }
  0x19   :  { %308 = vmatprep.subr.bf16.mxu0 %v350_v2 }
  0x1c   :  { %310 = vmatpush3.bf16.msra.mxu0 %v309_v25 }
  0x1d   :  { %311 = vmatprep.subr.bf16.mxu0 %v350_v2 }
  0x20   :  { %313 = vmatpush3.bf16.msra.mxu0 %v312_v28 }
  0x23   :  { %277 = vmatmul.mubr.f32.vlgmr.msra.gmra.mrb[0].mxu0 %v21_v29 }
  0xf6   :  { %v111_v34 = vpop.f32.mrb[0].mxu0 }
  0xf7   :  { %v112_v35 = vadd.f32 %v219_v33, %v111_v34  ;;  %v278_v36 = vpop.f32.mrb[1].mxu0 }
  0xf9   :  { %v115_v37 = vmax.f32 %v112_v35, 0.0 }
  0xfb   :  { %288 = vmatmul.mubr.msk.f32.vlgmr.msra.gmra.mrb[0].mxu1 %vm127_vm1, %v115_v37 }
 0x1ce   :  { %v197_v39 = vpop.f32.mrb[0].mxu1 }
 0x1cf   :  { %v198_v40 = vadd.f32 %v220_v38, %v197_v39  ;;  %v289_v41 = vpop.f32.mrb[1].mxu1 }
 0x1d1   :  { %202 = vst.msk [vmem:[#allocation2] sm:$0xff] %vm201_vm2, %v198_v40 }
 0x1d2   :  { %207 = vsyncadd [#allocation3], 96  ;;  %s353_s3 = smov [#allocation2]  }
 0x1d3   :  { %s208_s12 = sshll.u32 %s353_s3, 4  ;;  %s209_s12 = int_to_ptr.vmem [resolvable:$true] %s208_s12 }
 0x1d4   :  { %s326_s2 = scalar_lea.vmem %s209_s12, 32  ;;  %s330_s13 = scalar_lea.vmem %s209_s12, 128 }
 0x1d5   :  { %p327_p0 = scmp.ne.s32.totalorder %s209_s12, %s326_s2  ;;  %p331_p1 = scmp.lt.s32.totalorder %s209_s12, %s209_s12 }
 0x1d6   :  { %p332_p2 = scmp.lt.s32.totalorder %s330_s13, %s326_s2 }
 0x1d8   :  { %p333_p3 = por %p332_p2, %p331_p1 }
 0x1da   :  { %p334_p4 = pnand %p333_p3, %p327_p0 }
 0x1dc   :  { %337 = shalt.err (!%p334_p4)
}
 0x1dd   :  { %s338_s4 = scalar_lea.hbm %s472_s5, 32 }
 0x1de   :  { %p339_p5 = scmp.ne.s32.totalorder %s472_s5, %s338_s4  ;;  %p342_p6 = scmp.lt.u32.totalorder %s338_s4, %s472_s5 }
 0x1e0   :  { %p344_p7 = pnand %p342_p6, %p339_p5 }
 0x1e2   :  { %347 = shalt.err (!%p344_p7)
}
 0x1e3   :  { %s354_s20 = smov 32   ;;  %s355_s21 = smov 2  }
 0x1e4   :  { %214 = dma.vmem_to_hbm [thread:$0]  %s209_s12, 32, %s472_s5, [#allocation3], %s354_s20, %s354_s20, %s355_s21  }
 0x1e5   :  { %348 = dma.done.wait [#allocation3], 128  }
 0x1e6   :  { %349 = vsyncadd [#allocation3], 4294967168 }
 0x1e7   :  { %218 = vsyncpa [#allocation3], 1 }

</bundles_post_ra>
